<compile_context>
chip_gen: v5e
topology: v5e:2x2
jax: 0.10.0
libtpu: 0.0.40
codegen_flags: <defaults>
</compile_context>

<pallas_src>
import jax
import jax.numpy as jnp
from jax.experimental import pallas as pl
from jax.experimental.pallas import tpu as pltpu

BINS = 32        # stand-in for int(args.bins)
EMB_SIZ = 100    # module default emb_siz
T = 10.0         # module default temperature
NEG_SLOPE = 0.01 # nn.LeakyReLU default


def _round_up(a, b):
    return ((a + b - 1) // b) * b


def soft_lay_kernel(x_ref, w1_ref, weff_ref, w2_ref, o_ref):
    x = x_ref[...]                                       # (TN, 1) f32

    # lay1: Linear(1, bins) is a K=1 contraction -> broadcast multiply on the VPU.
    y = x * w1_ref[...]                                  # (TN,1)*(1,BINS) -> (TN,BINS)
    y = jnp.where(y >= 0, y, NEG_SLOPE * y)              # LeakyReLU

    # lin + residual + temperature, folded: w_eff = t*(Wlin + 0.1*I).
    # Kept in f32: these are the softmax logits (scaled by t), precision-sensitive.
    logits = jnp.dot(y, weff_ref[...], preferred_element_type=jnp.float32)

    # Numerically-stable softmax (dim=-1); reciprocal on the EUP slot.
    logits = logits - jnp.max(logits, axis=-1, keepdims=True)
    e = jnp.exp(logits)
    p = e * pl.reciprocal(jnp.sum(e, axis=-1, keepdims=True), approx=True)

    # lay2 Linear(bins, emb): bf16 MXU operands, f32 accumulate, store in out dtype.
    o_ref[...] = jnp.dot(p.astype(jnp.bfloat16), w2_ref[...],
                         preferred_element_type=jnp.float32).astype(o_ref.dtype)


def soft_lay_forward(x, w1, wlin, w2, t=T, tn=2048, out_dtype=jnp.float32):
    """x: (N,1); w1: (1,BINS); wlin: (BINS,BINS); w2: (BINS,EMB). Returns (N, EMB).

    tn: batch tile (clamped to a multiple of 8). Sweep 2048-4096 for large N.
    out_dtype: set jnp.bfloat16 to halve output HBM traffic (v5e/v6e) if the
    consumer tolerates it.
    """
    n = x.shape[0]
    bins = wlin.shape[0]
    emb = w2.shape[1]

    # Fold residual (+0.1*y) and temperature (*t) into the lin weight (constant transform).
    w_eff = (t * (wlin.astype(jnp.float32)
                  + 0.1 * jnp.eye(bins, dtype=jnp.float32)))

    x = x.astype(jnp.float32)
    w1 = w1.astype(jnp.float32)
    w2_bf16 = w2.astype(jnp.bfloat16)

    # Batch tile: multiple of 8, no larger than needed. cdiv grid handles the ragged
    # last block (padded input rows are row-local garbage; boundary stores are clipped),
    # so there is no wrapper-side padding and no output slice pass.
    tn = _round_up(min(tn, n), 8)
    grid_n = pl.cdiv(n, tn)
    # NOTE(v7x): with large N and tn=2048 the grid is long enough for the 2-TC
    # "parallel" sharding to stay balanced; tiny N fits a single step anyway.

    out = pl.pallas_call(
        soft_lay_kernel,
        out_shape=jax.ShapeDtypeStruct((n, emb), out_dtype),
        grid_spec=pltpu.PrefetchScalarGridSpec(
            num_scalar_prefetch=0,
            grid=(grid_n,),
            in_specs=[
                pl.BlockSpec((tn, 1), lambda i: (i, 0)),       # x tile, streamed
                pl.BlockSpec((1, bins), lambda i: (0, 0)),     # W1, resident
                pl.BlockSpec((bins, bins), lambda i: (0, 0)),  # W_eff (f32), resident
                pl.BlockSpec((bins, emb), lambda i: (0, 0)),   # W2 (bf16), resident
            ],
            out_specs=pl.BlockSpec((tn, emb), lambda i: (i, 0)),
        ),
        compiler_params=pltpu.CompilerParams(
            dimension_semantics=("parallel",)),
    )(x, w1, w_eff, w2_bf16)

    return out


def _reference(x, w1, wlin, w2, t=T):
    y = x @ w1
    y = jnp.where(y >= 0, y, NEG_SLOPE * y)
    y = y @ wlin + 0.1 * y
    y = y * t
    y = jax.nn.softmax(y, axis=-1)
    return y @ w2


if __name__ == "__main__":
    key = jax.random.PRNGKey(0)
    kx, k1, k2, k3 = jax.random.split(key, 4)

    # Deterministic synthetic weights (PyTorch-Linear-like uniform ranges).
    w1 = jax.random.uniform(k1, (1, BINS), jnp.float32, -1.0, 1.0)     # fan_in = 1
    b_lim = 1.0 / jnp.sqrt(jnp.float32(BINS))
    wlin = jax.random.uniform(k2, (BINS, BINS), jnp.float32, -b_lim, b_lim)
    w2 = jax.random.uniform(k3, (BINS, EMB_SIZ), jnp.float32, -b_lim, b_lim)

    # Small batch: single-tile path (tn clamps down to 8).
    N = 8
    x = jax.random.normal(kx, (N, 1), dtype=jnp.float32)
    out = jax.block_until_ready(soft_lay_forward(x, w1, wlin, w2))
    ref = _reference(x, w1, wlin, w2)
    assert out.shape == (N, EMB_SIZ)
    # approx reciprocal + bf16 p@W2 -> slightly looser tolerance than exact.
    assert jnp.allclose(out, ref, atol=5e-3, rtol=5e-3), "mismatch vs reference (small)"

    # Larger, non-multiple batch: exercises the cdiv grid with a ragged last block.
    N2 = 300
    x2 = jax.random.normal(jax.random.PRNGKey(7), (N2, 1), dtype=jnp.float32)
    out2 = jax.block_until_ready(soft_lay_forward(x2, w1, wlin, w2, tn=128))
    ref2 = _reference(x2, w1, wlin, w2)
    assert out2.shape == (N2, EMB_SIZ)
    assert jnp.allclose(out2, ref2, atol=5e-3, rtol=5e-3), "mismatch vs reference (tiled)"

    print("KERNEL_OK")
</pallas_src>

<mosaic_0001>
module attributes {stable_mosaic.version = 11 : i64} {
  func.func @soft_lay_kernel(%arg0: i32, %arg1: memref<8x1xf32, #tpu.memory_space<vmem>>, %arg2: memref<1x32xf32, #tpu.memory_space<vmem>>, %arg3: memref<32x32xf32, #tpu.memory_space<vmem>>, %arg4: memref<32x100xbf16, #tpu.memory_space<vmem>>, %arg5: memref<8x100xf32, #tpu.memory_space<vmem>>) attributes {dimension_semantics = [#tpu.dimension_semantics<parallel>], iteration_bounds = array<i64: 1>, scalar_prefetch = 0 : i64, scratch_operands = 0 : i64, tpu.core_type = #tpu.core_type<tc>, window_params = [{transform_indices = @transform_0, window_bounds = array<i64: 8, 1>}, {pipeline_mode = #tpu.pipeline_mode<synchronous>, transform_indices = @transform_1, window_bounds = array<i64: 1, 32>}, {pipeline_mode = #tpu.pipeline_mode<synchronous>, transform_indices = @transform_2, window_bounds = array<i64: 32, 32>}, {pipeline_mode = #tpu.pipeline_mode<synchronous>, transform_indices = @transform_3, window_bounds = array<i64: 32, 100>}, {transform_indices = @transform_4, window_bounds = array<i64: 8, 100>}]} {
    %c0 = arith.constant 0 : index
    %c0_0 = arith.constant 0 : index
    %0 = vector.load %arg1[%c0, %c0_0] : memref<8x1xf32, #tpu.memory_space<vmem>>, vector<8x1xf32>
    %c0_1 = arith.constant 0 : index
    %c0_2 = arith.constant 0 : index
    %1 = vector.load %arg2[%c0_1, %c0_2] : memref<1x32xf32, #tpu.memory_space<vmem>>, vector<1x32xf32>
    %2 = vector.broadcast %0 : vector<8x1xf32> to vector<8x32xf32>
    %3 = vector.broadcast %1 : vector<1x32xf32> to vector<8x32xf32>
    %4 = arith.mulf %2, %3 : vector<8x32xf32>
    %cst = arith.constant 0.000000e+00 : f32
    %5 = vector.broadcast %cst : f32 to vector<8x32xf32>
    %6 = arith.cmpf oge, %4, %5 : vector<8x32xf32>
    %cst_3 = arith.constant 0.00999999977 : f32
    %7 = vector.broadcast %cst_3 : f32 to vector<8x32xf32>
    %8 = arith.mulf %7, %4 : vector<8x32xf32>
    %9 = arith.select %6, %4, %8 : vector<8x32xi1>, vector<8x32xf32>
    %c0_4 = arith.constant 0 : index
    %c0_5 = arith.constant 0 : index
    %10 = vector.load %arg3[%c0_4, %c0_5] : memref<32x32xf32, #tpu.memory_space<vmem>>, vector<32x32xf32>
    %cst_6 = arith.constant dense<0.000000e+00> : vector<8x32xf32>
    %11 = tpu.matmul %9, %10, %cst_6 {dimension_numbers = #tpu.dot_dimension_numbers<[1], [0], [0], [1], [0, 0, 1, 1], [], []>} : vector<8x32xf32>, vector<32x32xf32>, vector<8x32xf32> -> vector<8x32xf32>
    %cst_7 = arith.constant dense<0xFF800000> : vector<8xf32>
    %12 = vector.multi_reduction <maximumf>, %11, %cst_7 [1] : vector<8x32xf32> to vector<8xf32>
    %13 = vector.shape_cast %12 : vector<8xf32> to vector<8x1xf32>
    %14 = vector.broadcast %13 : vector<8x1xf32> to vector<8x32xf32>
    %15 = arith.subf %11, %14 : vector<8x32xf32>
    %16 = math.exp %15 : vector<8x32xf32>
    %cst_8 = arith.constant dense<0.000000e+00> : vector<8xf32>
    %17 = vector.multi_reduction <add>, %16, %cst_8 [1] : vector<8x32xf32> to vector<8xf32>
    %18 = vector.shape_cast %17 : vector<8xf32> to vector<8x1xf32>
    %19 = tpu.reciprocal %18 {approx = true} : vector<8x1xf32> -> vector<8x1xf32>
    %20 = vector.broadcast %19 : vector<8x1xf32> to vector<8x32xf32>
    %21 = arith.mulf %16, %20 : vector<8x32xf32>
    %22 = arith.truncf %21 : vector<8x32xf32> to vector<8x32xbf16>
    %c0_9 = arith.constant 0 : index
    %c0_10 = arith.constant 0 : index
    %23 = vector.load %arg4[%c0_9, %c0_10] : memref<32x100xbf16, #tpu.memory_space<vmem>>, vector<32x100xbf16>
    %cst_11 = arith.constant dense<0.000000e+00> : vector<8x100xf32>
    %24 = tpu.matmul %22, %23, %cst_11 {dimension_numbers = #tpu.dot_dimension_numbers<[1], [0], [0], [1], [0, 0, 1, 1], [], []>} : vector<8x32xbf16>, vector<32x100xbf16>, vector<8x100xf32> -> vector<8x100xf32>
    %c0_12 = arith.constant 0 : index
    %c0_13 = arith.constant 0 : index
    %25 = vector.load %arg5[%c0_12, %c0_13] : memref<8x100xf32, #tpu.memory_space<vmem>>, vector<8x100xf32>
    tpu.vector_store %arg5[%c0_12, %c0_13], %24 {strides = array<i32>} : memref<8x100xf32, #tpu.memory_space<vmem>>, vector<8x100xf32>,
    return
  }
  func.func @transform_0(%arg0: i32) -> (i32, i32) {
    %c0_i32 = arith.constant 0 : i32
    %c0_i32_0 = arith.constant 0 : i32
    return %arg0, %c0_i32 : i32, i32
  }
  func.func @transform_1(%arg0: i32) -> (i32, i32) {
    %c0_i32 = arith.constant 0 : i32
    %c0_i32_0 = arith.constant 0 : i32
    %c0_i32_1 = arith.constant 0 : i32
    return %c0_i32, %c0_i32_0 : i32, i32
  }
  func.func @transform_2(%arg0: i32) -> (i32, i32) {
    %c0_i32 = arith.constant 0 : i32
    %c0_i32_0 = arith.constant 0 : i32
    %c0_i32_1 = arith.constant 0 : i32
    return %c0_i32, %c0_i32_0 : i32, i32
  }
  func.func @transform_3(%arg0: i32) -> (i32, i32) {
    %c0_i32 = arith.constant 0 : i32
    %c0_i32_0 = arith.constant 0 : i32
    %c0_i32_1 = arith.constant 0 : i32
    return %c0_i32, %c0_i32_0 : i32, i32
  }
  func.func @transform_4(%arg0: i32) -> (i32, i32) {
    %c0_i32 = arith.constant 0 : i32
    %c0_i32_0 = arith.constant 0 : i32
    return %arg0, %c0_i32 : i32, i32
  }
}

</mosaic_0001>

<bundles_post_ra>
// kernel: tpu_custom_call.1
= control target key start
LH: loop header
LB: loop body
LE: loop exit
PB: predicated region body
PF: predicated region fallthrough
CT: control target
= control target key end

     0   :  { %9 = vsyncpa [#allocation3], 0  ;;  %s313_s0 = inlined_call_operand.vmem [shape: f32[8,1], index: 0, kind: input, shape index: {}]   ;;  %s314_s1 = inlined_call_operand.vmem [shape: f32[1,32], index: 1, kind: input, shape index: {}]   ;;  %s315_s2 = inlined_call_operand.hbm [shape: f32[32,32], index: 2, kind: input, shape index: {}]   ;;  %s316_s3 = inlined_call_operand.hbm [shape: bf16[32,100], index: 3, kind: input, shape index: {}]   ;;  %s317_s4 = inlined_call_operand.hbm [shape: f32[8,100], index: 4, kind: output, shape index: {}]  }
   0x1   :  { %10 = vsyncpa [#allocation6], 0 }
   0x2   :  { %11 = vsyncpa [#allocation4], 0  ;;  %s20_s17 = sshll.u32 %s315_s2, 4  ;;  %s261_s18 = smov [#allocation2]   ;;  %s21_s17 = int_to_ptr.hbm [resolvable:$true] %s20_s17 }
   0x3   :  { %s22_s19 = sshll.u32 %s261_s18, 4  ;;  %s33_s22 = sshll.u32 %s316_s3, 4  ;;  %s23_s19 = int_to_ptr.vmem [resolvable:$true] %s22_s19  ;;  %s34_s22 = int_to_ptr.hbm [resolvable:$true] %s33_s22 }
   0x4   :  { %s262_s23 = smov 128   ;;  %s263_s24 = smov 8  }
   0x5   :  { %28 = dma.hbm_to_vmem [thread:$0]  %s21_s17, 512, %s23_s19, [#allocation3], %s262_s23, %s262_s23, %s263_s24  }
   0x6   :  { %s264_s25 = smov [#allocation5]   ;;  %s265_s27 = smov 64  }
   0x7   :  { %s35_s26 = sshll.u32 %s264_s25, 4  ;;  %s266_s28 = smov 4   ;;  %s36_s26 = int_to_ptr.vmem [resolvable:$true] %s35_s26 }
   0x8   :  { %41 = dma.hbm_to_vmem [thread:$0]  %s34_s22, 256, %s36_s26, [#allocation6], %s265_s27, %s265_s27, %s266_s28  }
   0x9   :  { %255 = dma.done.wait [#allocation3], 512  }
   0xa   :  { %256 = vsyncadd [#allocation3], 4294966784 }
   0xb   :  { %257 = dma.done.wait [#allocation6], 256  }
   0xc   :  { %258 = vsyncadd [#allocation6], 4294967040  ;;  %v267_v0 = vmov 0   ;;  %v51_v1 = vld [vmem:[%s313_s0] sm:$0xff]  ;;  %v68_v2 = vld [vmem:[#allocation2 + $0x18] sm:$0xff]  ;;  %vm69_vm1 = vcmask 261120  }
   0xd   :  { %177 = vset.pattern.permute.xlu0 %v267_v0  ;;  %85 = vmatpush.msra.mxu0 %v68_v2  ;;  %v67_v3 = vld [vmem:[#allocation2 + $0x10] sm:$0xff]  ;;  %v66_v4 = vld [vmem:[#allocation2 + $0x8] sm:$0xff]  ;;  %v65_v5 = vld [vmem:[#allocation2] sm:$0xff]  ;;  %s268_s0 = smov [#allocation7]   ;;  %s146_s7 = sshll.u32 %s317_s4, 4  ;;  %vm137_vm2 = vcmask 818176   ;;  %s147_s7 = int_to_ptr.hbm [resolvable:$true] %s146_s7 }
   0xe   :  { %55 = vperm.xlu0 %177, %v51_v1   ;;  %v178_v6 = vld [vmem:[%s314_s1] ss:$0 sm:$0xff]  ;;  %v168_v18 = vld [vmem:[#allocation5 + $0x8] sm:$0xff]  ;;  %s144_s1 = sshll.u32 %s268_s0, 4  ;;  %s145_s1 = int_to_ptr.vmem [resolvable:$true] %s144_s1 }
   0xf   :  { %86 = vmatpush.msra.mxu0 %v67_v3  ;;  %130 = vmatpush.bf16.msra.mxu1 %v168_v18  ;;  %v167_v19 = vld [vmem:[#allocation5] sm:$0xff] }
  0x11   :  { %87 = vmatpush.msra.mxu0 %v66_v4 }
  0x13   :  { %88 = vmatpush.msra.mxu0 %v65_v5  ;;  %131 = vmatpush.bf16.msra.mxu1 %v167_v19 }
  0x80   :  { %v56_v7 = vpop.permute.xlu0 %55 }
  0x81   :  { %v61_v8 = vmul.f32 %v178_v6, %v56_v7 }
  0x83   :  { %v63_v9 = vmul.f32 0.01, %v61_v8  ;;  %vm62_vm0 = vcmp.ge.f32.partialorder %v61_v8, 0.0 }
  0x85   :  { %v64_v10 = vsel %vm62_vm0, %v61_v8, %v63_v9 }
  0x86   :  { %157 = vmatmul.msk.f32.vlgmr.msra.gmra.mxu0 %vm69_vm1, %v64_v10 }
 0x103   :  { %v90_v11 = vpop.f32.mrf.mxu0 }
 0x104   :  { %v93_v12 = vsel %vm69_vm1, %v90_v11, -inf }
 0x105   :  { %94 = vmax.xlane.f32.xlu0 %v93_v12 }
 0x178   :  { %v95_v13 = vpop.xlane.xlu0 %94 }
 0x179   :  { %v96_v14 = vsub.f32 %v90_v11, %v95_v13 }
 0x17b   :  { %v97_v15 = vmul.f32 1.442695, %v96_v14 }
 0x17d   :  { %179 = vpow2.f32 %v97_v15 }
 0x183   :  { %v180_v16 = vpop.eup %179 }
 0x184   :  { %v99_v17 = vsel %vm69_vm1, %v180_v16, 0.0 }
 0x185   :  { %100 = vadd.xlane.f32.xlu1 %v99_v17 }
 0x1f8   :  { %v101_v20 = vpop.xlane.xlu1 %100 }
 0x1f9   :  { %181 = vrcp.f32 %v101_v20 }
 0x1ff   :  { %v182_v21 = vpop.eup %181 }
 0x200   :  { %v103_v22 = vmul.f32 %v182_v21, %v180_v16 }
 0x202   :  { %v104_v23 = vpack.c.bf16 %v103_v22, %v103_v22 }
 0x204   :  { %166 = vmatmul.msk.bf16.vlgmr.msra.gmra.mxu1 %vm69_vm1, %v104_v23 }
 0x281   :  { %v133_v24 = vpop.f32.mrf.mxu1 }
 0x282   :  { %138 = vst.msk [vmem:[#allocation7] sm:$0xff] %vm137_vm2, %v133_v24 }
 0x283   :  { %149 = dma.vmem_to_hbm [thread:$0]  %s145_s1, 128, %s147_s7, [#allocation4]  }
 0x289   :  { %v135_v25 = vpop.f32.mrf.mxu1 }
 0x28a   :  { %259 = dma.done.wait [#allocation4], 128  }
 0x28b   :  { %260 = vsyncadd [#allocation4], 4294967168 }
 0x28c   :  { %154 = vsyncpa [#allocation3], 1 }
 0x28d   :  { %155 = vsyncpa [#allocation6], 1 }
 0x28e   :  { %156 = vsyncpa [#allocation4], 1 }

</bundles_post_ra>
